<compile_context>
chip_gen: v6e
topology: v6e:2x2x1
jax: 0.10.0
libtpu: 0.0.40
codegen_flags: <defaults>
</compile_context>

<pallas_src>
import math

import jax
import jax.numpy as jnp
from jax import lax
from jax.experimental import pallas as pl
from jax.experimental.pallas import tpu as pltpu


# =============================================================================
# Kernel 1: TanhAttention + CrossGate + bi-GRU input projection.
# One grid step = (one batch element) x (one tile of Tv visual frames).
# =============================================================================
def _attn_gate_proj_kernel(vis_ref, txt_ref, msk_ref,
                           w1g_ref, b1g_ref, w2_ref, wst_ref,
                           wg2_ref, bg2_ref,
                           wih_top_ref, wih_bot_ref, bih_ref,
                           xg_ref):
    D = vis_ref.shape[-1]

    vis = vis_ref[...].astype(jnp.float32)             # [tvb, D]
    txt = txt_ref[...].astype(jnp.float32)             # [Tt, D]
    msk = msk_ref[...]                                  # [1, Tt] (1.0 valid)
    vis_bf = vis.astype(jnp.bfloat16)
    txt_bf = txt.astype(jnp.bfloat16)

    # --- fused visual projections: [ws1(vis) | gate1-logits(vis)] in ONE matmul
    proj = jnp.dot(vis_bf, w1g_ref[...],
                   preferred_element_type=jnp.float32) + b1g_ref[...]   # [tvb, 2D]
    item1 = proj[:, :D]                                 # TanhAttention ws1(vis)
    g1 = jax.nn.sigmoid(proj[:, D:])                    # CrossGate gate of visual

    item2 = jnp.dot(txt_bf, w2_ref[...],
                    preferred_element_type=jnp.float32)                 # [Tt, D]

    # --- additive-attention scores (tanh kept in f32).
    t3 = jnp.tanh(item1[:, None, :] + item2[None, :, :])                # [tvb, Tt, D]
    scores = jnp.sum(t3 * wst_ref[...][None, :, :], axis=-1)            # [tvb, Tt]
    # TODO(synk): the D-contraction stays on the XLU; the MXU alternative
    # ([tvb*Tt, D] @ [D, 1]) needs a lane-changing reshape of the result that is
    # a Mosaic-lowering risk at these (unpadded, D<128) shapes.

    scores = jnp.where(msk > 0.0, scores, jnp.float32(-1e30))
    scores = scores - jnp.max(scores, axis=-1, keepdims=True)
    p = jnp.exp(scores)
    attn = p * pl.reciprocal(jnp.sum(p, axis=-1, keepdims=True), approx=True)

    agg = jnp.dot(attn.astype(jnp.bfloat16), txt_bf,
                  preferred_element_type=jnp.float32)                   # [tvb, D]

    # --- CrossGate
    agg_h = g1 * agg                                                    # gated text
    g2 = jax.nn.sigmoid(jnp.dot(agg.astype(jnp.bfloat16), wg2_ref[...],
                                preferred_element_type=jnp.float32) + bg2_ref[...])
    vis_h = g2 * vis                                                    # gated visual

    # --- bi-GRU input projection, both directions at once, no lane concat:
    #   xg = [vis_h | agg_h] @ [w_ih_f | w_ih_b] + [b_ih_f | b_ih_b]    # [tvb, 6H]
    xg = (jnp.dot(vis_h.astype(jnp.bfloat16), wih_top_ref[...],
                  preferred_element_type=jnp.float32)
          + jnp.dot(agg_h.astype(jnp.bfloat16), wih_bot_ref[...],
                    preferred_element_type=jnp.float32)
          + bih_ref[...])
    xg_ref[...] = xg


# =============================================================================
# Kernel 2: batched bidirectional GRU recurrence (time-major).
#   xg_ref : [T, B, 6H]  precomputed input projections ([fwd 3H | bwd 3H])
#   whh_ref: [2H, 6H]    blockdiag(w_hh_f, w_hh_b), bf16
#   bhh_ref: [1, 6H]     [b_hh_f | b_hh_b]
#   outputs: out_f [T, B, H], out_b [T, B, H]
# =============================================================================
def _bigru_kernel(xg_ref, whh_ref, bhh_ref, outf_ref, outb_ref, h_ref):
    T = xg_ref.shape[0]
    H = outf_ref.shape[-1]
    whh = whh_ref[...]                      # bf16 block-diagonal recurrent weight
    bhh = bhh_ref[...]                      # f32
    h_ref[...] = jnp.zeros_like(h_ref)      # h = [h_fwd | h_bwd], zero init (f32)

    def step(t, carry):
        tf = t
        tb = T - 1 - t
        h = h_ref[...]                                                  # [B, 2H] f32
        # ONE recurrent matmul for both directions and all batch rows.
        hg = jnp.dot(h.astype(jnp.bfloat16), whh,
                     preferred_element_type=jnp.float32) + bhh          # [B, 6H]
        row_f = xg_ref[tf]                                              # [B, 6H]
        row_b = xg_ref[tb]                                              # [B, 6H]
        h_f, h_b = h[:, :H], h[:, H:]

        # forward direction, PyTorch gate order (r, z, n) in columns [0:3H]
        r_f = jax.nn.sigmoid(row_f[:, 0:H] + hg[:, 0:H])
        z_f = jax.nn.sigmoid(row_f[:, H:2 * H] + hg[:, H:2 * H])
        n_f = jnp.tanh(row_f[:, 2 * H:3 * H] + r_f * hg[:, 2 * H:3 * H])
        hf_new = (1.0 - z_f) * n_f + z_f * h_f

        # backward direction in columns [3H:6H]
        r_b = jax.nn.sigmoid(row_b[:, 3 * H:4 * H] + hg[:, 3 * H:4 * H])
        z_b = jax.nn.sigmoid(row_b[:, 4 * H:5 * H] + hg[:, 4 * H:5 * H])
        n_b = jnp.tanh(row_b[:, 5 * H:6 * H] + r_b * hg[:, 5 * H:6 * H])
        hb_new = (1.0 - z_b) * n_b + z_b * h_b

        outf_ref[tf] = hf_new
        outb_ref[tb] = hb_new
        h_ref[...] = jnp.concatenate([hf_new, hb_new], axis=-1)
        return carry

    lax.fori_loop(0, T, step, 0)


# =============================================================================
# Wrapper (mirrors BetterFusion.forward).  Returns fused_h: [B, Tv, D].
# =============================================================================
def better_fusion(params, textual_input, text_len, textual_mask, visual_input,
                  fast_weights=None, tv_block=None):
    if fast_weights is not None:
        return (None, None)
    del text_len  # TODO(synk): DynamicGRU packing path unused - module calls fuse_gru(x, None).

    B, Tv, D = visual_input.shape
    Tt = textual_input.shape[1]
    H = D // 2
    f32, bf16 = jnp.float32, jnp.bfloat16

    if tv_block is None:
        tv_block = Tv if Tv <= 128 else 128
    assert Tv % tv_block == 0, (Tv, tv_block)
    n_tv = Tv // tv_block

    # --- host-side weight packing (fused layouts, bf16 matmul operands) ---
    w1g = jnp.concatenate([params["w1"], params["wg1"]], axis=1).astype(bf16)        # [D, 2D]
    b1g = jnp.concatenate([params["b1"], params["bg1"]], axis=1).astype(f32)         # [1, 2D]
    w2 = params["w2"].astype(bf16)                                                   # [D, D]
    wst = params["wst"].astype(f32)                                                  # [1, D]
    wg2 = params["wg2"].astype(bf16)
    bg2 = params["bg2"].astype(f32)
    wih_cat = jnp.concatenate([params["w_ih_f"], params["w_ih_b"]], axis=1)          # [2D, 6H]
    wih_top = wih_cat[:D].astype(bf16)                                               # [D, 6H]
    wih_bot = wih_cat[D:].astype(bf16)                                               # [D, 6H]
    bih = jnp.concatenate([params["b_ih_f"], params["b_ih_b"]], axis=1).astype(f32)  # [1, 6H]
    # Block-diagonal recurrent weight so fwd+bwd hidden update is ONE matmul.
    whh_bd = jnp.zeros((2 * H, 6 * H), f32)
    whh_bd = whh_bd.at[:H, :3 * H].set(params["w_hh_f"])
    whh_bd = whh_bd.at[H:, 3 * H:].set(params["w_hh_b"])
    whh_bd = whh_bd.astype(bf16)
    bhh = jnp.concatenate([params["b_hh_f"], params["b_hh_b"]], axis=1).astype(f32)  # [1, 6H]

    msk = textual_mask.astype(f32).reshape(B, 1, Tt)

    weights1 = [w1g, b1g, w2, wst, wg2, bg2, wih_top, wih_bot, bih]

    def _wspec(w):
        # TODO(synk): weights are constant across the grid; single-buffering them
        # (pipeline_mode=pl.Buffered(1)) would halve their VMEM footprint on v7x.
        return pl.BlockSpec(w.shape, lambda b, v: (0, 0))

    # ---- kernel 1: attention + cross-gate + GRU input projection -----------
    xg = pl.pallas_call(
        _attn_gate_proj_kernel,
        out_shape=jax.ShapeDtypeStruct((B, Tv, 6 * H), f32),
        grid=(B, n_tv),
        in_specs=[pl.BlockSpec((None, tv_block, D), lambda b, v: (b, v, 0)),
                  pl.BlockSpec((None, Tt, D), lambda b, v: (b, 0, 0)),
                  pl.BlockSpec((None, 1, Tt), lambda b, v: (b, 0, 0))]
                 + [_wspec(w) for w in weights1],
        out_specs=pl.BlockSpec((None, tv_block, 6 * H), lambda b, v: (b, v, 0)),
        compiler_params=pltpu.CompilerParams(
            dimension_semantics=("parallel", "parallel")),
    )(visual_input, textual_input, msk, *weights1)

    # ---- kernel 2: batched bidirectional GRU recurrence ---------------------
    xg_tm = jnp.transpose(xg, (1, 0, 2))                    # time-major [Tv, B, 6H]
    out_f, out_b = pl.pallas_call(
        _bigru_kernel,
        out_shape=(jax.ShapeDtypeStruct((Tv, B, H), f32),
                   jax.ShapeDtypeStruct((Tv, B, H), f32)),
        grid=(1,),
        in_specs=[pl.BlockSpec((Tv, B, 6 * H), lambda i: (0, 0, 0)),
                  pl.BlockSpec((2 * H, 6 * H), lambda i: (0, 0)),
                  pl.BlockSpec((1, 6 * H), lambda i: (0, 0))],
        out_specs=(pl.BlockSpec((Tv, B, H), lambda i: (0, 0, 0)),
                   pl.BlockSpec((Tv, B, H), lambda i: (0, 0, 0))),
        scratch_shapes=[pltpu.VMEM((B, 2 * H), f32)],
        compiler_params=pltpu.CompilerParams(
            dimension_semantics=("arbitrary",)),
    )(xg_tm, whh_bd, bhh)

    # [B, Tv, D] = concat(forward_H, backward_H) per time step (PyTorch layout).
    return jnp.transpose(jnp.concatenate([out_f, out_b], axis=-1), (1, 0, 2))


# -----------------------------------------------------------------------------
# Deterministic parameter initialization (shapes implied by the module).
# -----------------------------------------------------------------------------
def init_params(key, D):
    H = D // 2
    ks = jax.random.split(key, 16)

    def u(k, shape, fan_in):
        b = 1.0 / math.sqrt(fan_in)
        return jax.random.uniform(k, shape, jnp.float32, -b, b)

    return {
        # TanhAttention: ws1 (with bias), ws2 (no bias), wst (D -> 1, no bias)
        "w1": u(ks[0], (D, D), D), "b1": u(ks[1], (1, D), D),
        "w2": u(ks[2], (D, D), D),
        "wst": u(ks[3], (1, D), D),
        # CrossGate: sigmoid(Linear(visual)) gates agg_txt and vice versa
        "wg1": u(ks[4], (D, D), D), "bg1": u(ks[5], (1, D), D),
        "wg2": u(ks[6], (D, D), D), "bg2": u(ks[7], (1, D), D),
        # Bidirectional GRU: input 2D, hidden H per direction, gates (r, z, n)
        "w_ih_f": u(ks[8], (2 * D, 3 * H), H), "w_hh_f": u(ks[9], (H, 3 * H), H),
        "b_ih_f": u(ks[10], (1, 3 * H), H), "b_hh_f": u(ks[11], (1, 3 * H), H),
        "w_ih_b": u(ks[12], (2 * D, 3 * H), H), "w_hh_b": u(ks[13], (H, 3 * H), H),
        "b_ih_b": u(ks[14], (1, 3 * H), H), "b_hh_b": u(ks[15], (1, 3 * H), H),
    }


# -----------------------------------------------------------------------------
# Plain-JAX reference.  Mirrors the kernel's bf16-matmul / f32-elementwise math
# so the check isolates the Pallas implementation (softmax uses exact division).
# -----------------------------------------------------------------------------
def reference(params, txt, msk, vis):
    B, Tv, D = vis.shape
    Tt = txt.shape[1]
    bf = lambda a: a.astype(jnp.bfloat16)
    mm = lambda a, b: jnp.dot(bf(a), bf(b), preferred_element_type=jnp.float32)

    def attn_gate(visb, txtb, mskb):
        item1 = mm(visb, params["w1"]) + params["b1"]
        g1 = jax.nn.sigmoid(mm(visb, params["wg1"]) + params["bg1"])
        item2 = mm(txtb, params["w2"])
        t3 = jnp.tanh(item1[:, None, :] + item2[None, :, :])
        scores = jnp.sum(t3 * params["wst"][0][None, None, :], axis=-1)
        scores = jnp.where(mskb[None, :] > 0, scores, -1e30)
        attn = jax.nn.softmax(scores, axis=-1)
        agg = mm(attn, txtb)
        agg_h = g1 * agg
        g2 = jax.nn.sigmoid(mm(agg, params["wg2"]) + params["bg2"])
        vis_h = g2 * visb
        xg_f = mm(vis_h, params["w_ih_f"][:D]) + mm(agg_h, params["w_ih_f"][D:]) + params["b_ih_f"]
        xg_b = mm(vis_h, params["w_ih_b"][:D]) + mm(agg_h, params["w_ih_b"][D:]) + params["b_ih_b"]
        return xg_f, xg_b

    def gru_dir(xg, w_hh, b_hh, reverse):
        T, H3 = xg.shape
        Hd = H3 // 3

        def step(i, carry):
            h, out = carry
            t = (T - 1 - i) if reverse else i
            xg_t = lax.dynamic_slice(xg, (t, 0), (1, 3 * Hd))
            hg = mm(h, w_hh) + b_hh
            r = jax.nn.sigmoid(xg_t[:, :Hd] + hg[:, :Hd])
            z = jax.nn.sigmoid(xg_t[:, Hd:2 * Hd] + hg[:, Hd:2 * Hd])
            n = jnp.tanh(xg_t[:, 2 * Hd:] + r * hg[:, 2 * Hd:])
            h_new = (1.0 - z) * n + z * h
            return h_new, lax.dynamic_update_slice(out, h_new, (t, 0))

        h0 = jnp.zeros((1, Hd), jnp.float32)
        out0 = jnp.zeros((T, Hd), jnp.float32)
        _, out = lax.fori_loop(0, T, step, (h0, out0))
        return out

    def per_batch(visb, txtb, mskb):
        xg_f, xg_b = attn_gate(visb, txtb, mskb)
        of = gru_dir(xg_f, params["w_hh_f"], params["b_hh_f"], reverse=False)
        ob = gru_dir(xg_b, params["w_hh_b"], params["b_hh_b"], reverse=True)
        return jnp.concatenate([of, ob], axis=-1)

    return jax.vmap(per_batch)(vis, txt, msk)


if __name__ == "__main__":
    B, Tv, Tt, D = 2, 16, 8, 32   # batch, visual frames, text tokens, hidden_size
    key = jax.random.PRNGKey(0)
    kp, kv, kt = jax.random.split(key, 3)

    params = init_params(kp, D)
    visual_input = jax.random.normal(kv, (B, Tv, D), jnp.float32)
    textual_input = jax.random.normal(kt, (B, Tt, D), jnp.float32)
    text_len = jnp.array([Tt, 5], jnp.int32)
    textual_mask = (jnp.arange(Tt)[None, :] < text_len[:, None]).astype(jnp.float32)

    fused_h = better_fusion(params, textual_input, text_len, textual_mask,
                            visual_input, tv_block=8)
    fused_h = jax.block_until_ready(fused_h)

    ref = reference(params, textual_input, textual_mask, visual_input)
    assert fused_h.shape == (B, Tv, D), fused_h.shape
    max_err = float(jnp.max(jnp.abs(fused_h - ref)))
    assert max_err < 3e-2, f"mismatch vs reference: {max_err}"
    print("KERNEL_OK")
</pallas_src>

<mosaic_0001>
module attributes {stable_mosaic.version = 11 : i64} {
  func.func @_attn_gate_proj_kernel(%arg0: i32, %arg1: i32, %arg2: memref<1x8x32xf32, #tpu.memory_space<vmem>>, %arg3: memref<1x8x32xf32, #tpu.memory_space<vmem>>, %arg4: memref<1x1x8xf32, #tpu.memory_space<vmem>>, %arg5: memref<32x64xbf16, #tpu.memory_space<vmem>>, %arg6: memref<1x64xf32, #tpu.memory_space<vmem>>, %arg7: memref<32x32xbf16, #tpu.memory_space<vmem>>, %arg8: memref<1x32xf32, #tpu.memory_space<vmem>>, %arg9: memref<32x32xbf16, #tpu.memory_space<vmem>>, %arg10: memref<1x32xf32, #tpu.memory_space<vmem>>, %arg11: memref<32x96xbf16, #tpu.memory_space<vmem>>, %arg12: memref<32x96xbf16, #tpu.memory_space<vmem>>, %arg13: memref<1x96xf32, #tpu.memory_space<vmem>>, %arg14: memref<1x8x96xf32, #tpu.memory_space<vmem>>) attributes {dimension_semantics = [#tpu.dimension_semantics<parallel>, #tpu.dimension_semantics<parallel>], iteration_bounds = array<i64: 2, 2>, scalar_prefetch = 0 : i64, scratch_operands = 0 : i64, tpu.core_type = #tpu.core_type<tc>, window_params = [{transform_indices = @transform_0, window_bounds = array<i64: 1, 8, 32>}, {transform_indices = @transform_1, window_bounds = array<i64: 1, 8, 32>}, {transform_indices = @transform_2, window_bounds = array<i64: 1, 1, 8>}, {pipeline_mode = #tpu.pipeline_mode<synchronous>, transform_indices = @transform_3, window_bounds = array<i64: 32, 64>}, {pipeline_mode = #tpu.pipeline_mode<synchronous>, transform_indices = @transform_4, window_bounds = array<i64: 1, 64>}, {pipeline_mode = #tpu.pipeline_mode<synchronous>, transform_indices = @transform_5, window_bounds = array<i64: 32, 32>}, {pipeline_mode = #tpu.pipeline_mode<synchronous>, transform_indices = @transform_6, window_bounds = array<i64: 1, 32>}, {pipeline_mode = #tpu.pipeline_mode<synchronous>, transform_indices = @transform_7, window_bounds = array<i64: 32, 32>}, {pipeline_mode = #tpu.pipeline_mode<synchronous>, transform_indices = @transform_8, window_bounds = array<i64: 1, 32>}, {pipeline_mode = #tpu.pipeline_mode<synchronous>, transform_indices = @transform_9, window_bounds = array<i64: 32, 96>}, {pipeline_mode = #tpu.pipeline_mode<synchronous>, transform_indices = @transform_10, window_bounds = array<i64: 32, 96>}, {pipeline_mode = #tpu.pipeline_mode<synchronous>, transform_indices = @transform_11, window_bounds = array<i64: 1, 96>}, {transform_indices = @transform_12, window_bounds = array<i64: 1, 8, 96>}]} {
    %c0 = arith.constant 0 : index
    %c0_0 = arith.constant 0 : index
    %c0_1 = arith.constant 0 : index
    %0 = vector.load %arg2[%c0, %c0_0, %c0_1] : memref<1x8x32xf32, #tpu.memory_space<vmem>>, vector<1x8x32xf32>
    %1 = vector.shape_cast %0 : vector<1x8x32xf32> to vector<8x32xf32>
    %c0_2 = arith.constant 0 : index
    %c0_3 = arith.constant 0 : index
    %c0_4 = arith.constant 0 : index
    %2 = vector.load %arg3[%c0_2, %c0_3, %c0_4] : memref<1x8x32xf32, #tpu.memory_space<vmem>>, vector<1x8x32xf32>
    %3 = vector.shape_cast %2 : vector<1x8x32xf32> to vector<8x32xf32>
    %c0_5 = arith.constant 0 : index
    %c0_6 = arith.constant 0 : index
    %c0_7 = arith.constant 0 : index
    %4 = vector.load %arg4[%c0_5, %c0_6, %c0_7] : memref<1x1x8xf32, #tpu.memory_space<vmem>>, vector<1x1x8xf32>
    %5 = vector.shape_cast %4 : vector<1x1x8xf32> to vector<1x8xf32>
    %6 = arith.truncf %1 : vector<8x32xf32> to vector<8x32xbf16>
    %7 = arith.truncf %3 : vector<8x32xf32> to vector<8x32xbf16>
    %c0_8 = arith.constant 0 : index
    %c0_9 = arith.constant 0 : index
    %8 = vector.load %arg5[%c0_8, %c0_9] : memref<32x64xbf16, #tpu.memory_space<vmem>>, vector<32x64xbf16>
    %cst = arith.constant dense<0.000000e+00> : vector<8x64xf32>
    %9 = tpu.matmul %6, %8, %cst {dimension_numbers = #tpu.dot_dimension_numbers<[1], [0], [0], [1], [0, 0, 1, 1], [], []>} : vector<8x32xbf16>, vector<32x64xbf16>, vector<8x64xf32> -> vector<8x64xf32>
    %c0_10 = arith.constant 0 : index
    %c0_11 = arith.constant 0 : index
    %10 = vector.load %arg6[%c0_10, %c0_11] : memref<1x64xf32, #tpu.memory_space<vmem>>, vector<1x64xf32>
    %11 = vector.broadcast %10 : vector<1x64xf32> to vector<8x64xf32>
    %12 = arith.addf %9, %11 : vector<8x64xf32>
    %13 = vector.extract_strided_slice %12 {offsets = [0, 0], sizes = [8, 32], strides = [1, 1]} : vector<8x64xf32> to vector<8x32xf32>
    %14 = vector.extract_strided_slice %12 {offsets = [0, 32], sizes = [8, 32], strides = [1, 1]} : vector<8x64xf32> to vector<8x32xf32>
    %15 = arith.negf %14 : vector<8x32xf32>
    %16 = math.exp %15 : vector<8x32xf32>
    %cst_12 = arith.constant 1.000000e+00 : f32
    %17 = vector.broadcast %cst_12 : f32 to vector<8x32xf32>
    %18 = arith.addf %17, %16 : vector<8x32xf32>
    %19 = arith.divf %17, %18 : vector<8x32xf32>
    %c0_13 = arith.constant 0 : index
    %c0_14 = arith.constant 0 : index
    %20 = vector.load %arg7[%c0_13, %c0_14] : memref<32x32xbf16, #tpu.memory_space<vmem>>, vector<32x32xbf16>
    %cst_15 = arith.constant dense<0.000000e+00> : vector<8x32xf32>
    %21 = tpu.matmul %7, %20, %cst_15 {dimension_numbers = #tpu.dot_dimension_numbers<[1], [0], [0], [1], [0, 0, 1, 1], [], []>} : vector<8x32xbf16>, vector<32x32xbf16>, vector<8x32xf32> -> vector<8x32xf32>
    %22 = vector.shape_cast %13 : vector<8x32xf32> to vector<8x1x32xf32>
    %23 = vector.shape_cast %21 : vector<8x32xf32> to vector<1x8x32xf32>
    %24 = vector.broadcast %22 : vector<8x1x32xf32> to vector<8x8x32xf32>
    %25 = vector.broadcast %23 : vector<1x8x32xf32> to vector<8x8x32xf32>
    %26 = arith.addf %24, %25 : vector<8x8x32xf32>
    %27 = math.tanh %26 : vector<8x8x32xf32>
    %c0_16 = arith.constant 0 : index
    %c0_17 = arith.constant 0 : index
    %28 = vector.load %arg8[%c0_16, %c0_17] : memref<1x32xf32, #tpu.memory_space<vmem>>, vector<1x32xf32>
    %29 = vector.shape_cast %28 : vector<1x32xf32> to vector<1x1x32xf32>
    %30 = vector.broadcast %29 : vector<1x1x32xf32> to vector<8x8x32xf32>
    %31 = arith.mulf %27, %30 : vector<8x8x32xf32>
    %cst_18 = arith.constant dense<0.000000e+00> : vector<8x8xf32>
    %32 = vector.multi_reduction <add>, %31, %cst_18 [2] : vector<8x8x32xf32> to vector<8x8xf32>
    %cst_19 = arith.constant 0.000000e+00 : f32
    %33 = vector.broadcast %cst_19 : f32 to vector<1x8xf32>
    %34 = arith.cmpf ogt, %5, %33 : vector<1x8xf32>
    %cst_20 = arith.constant -1.000000e+30 : f32
    %35 = vector.shape_cast %34 : vector<1x8xi1> to vector<1x8xi1>
    %36 = vector.broadcast %35 : vector<1x8xi1> to vector<8x8xi1>
    %37 = vector.broadcast %cst_20 : f32 to vector<8x8xf32>
    %38 = arith.select %36, %32, %37 : vector<8x8xi1>, vector<8x8xf32>
    %cst_21 = arith.constant dense<0xFF800000> : vector<8xf32>
    %39 = vector.multi_reduction <maximumf>, %38, %cst_21 [1] : vector<8x8xf32> to vector<8xf32>
    %40 = vector.shape_cast %39 : vector<8xf32> to vector<8x1xf32>
    %41 = vector.broadcast %40 : vector<8x1xf32> to vector<8x8xf32>
    %42 = arith.subf %38, %41 : vector<8x8xf32>
    %43 = math.exp %42 : vector<8x8xf32>
    %cst_22 = arith.constant dense<0.000000e+00> : vector<8xf32>
    %44 = vector.multi_reduction <add>, %43, %cst_22 [1] : vector<8x8xf32> to vector<8xf32>
    %45 = vector.shape_cast %44 : vector<8xf32> to vector<8x1xf32>
    %46 = tpu.reciprocal %45 {approx = true} : vector<8x1xf32> -> vector<8x1xf32>
    %47 = vector.broadcast %46 : vector<8x1xf32> to vector<8x8xf32>
    %48 = arith.mulf %43, %47 : vector<8x8xf32>
    %49 = arith.truncf %48 : vector<8x8xf32> to vector<8x8xbf16>
    %cst_23 = arith.constant dense<0.000000e+00> : vector<8x32xf32>
    %50 = tpu.matmul %49, %7, %cst_23 {dimension_numbers = #tpu.dot_dimension_numbers<[1], [0], [0], [1], [0, 0, 1, 1], [], []>} : vector<8x8xbf16>, vector<8x32xbf16>, vector<8x32xf32> -> vector<8x32xf32>
    %51 = arith.mulf %19, %50 : vector<8x32xf32>
    %52 = arith.truncf %50 : vector<8x32xf32> to vector<8x32xbf16>
    %c0_24 = arith.constant 0 : index
    %c0_25 = arith.constant 0 : index
    %53 = vector.load %arg9[%c0_24, %c0_25] : memref<32x32xbf16, #tpu.memory_space<vmem>>, vector<32x32xbf16>
    %cst_26 = arith.constant dense<0.000000e+00> : vector<8x32xf32>
    %54 = tpu.matmul %52, %53, %cst_26 {dimension_numbers = #tpu.dot_dimension_numbers<[1], [0], [0], [1], [0, 0, 1, 1], [], []>} : vector<8x32xbf16>, vector<32x32xbf16>, vector<8x32xf32> -> vector<8x32xf32>
    %c0_27 = arith.constant 0 : index
    %c0_28 = arith.constant 0 : index
    %55 = vector.load %arg10[%c0_27, %c0_28] : memref<1x32xf32, #tpu.memory_space<vmem>>, vector<1x32xf32>
    %56 = vector.broadcast %55 : vector<1x32xf32> to vector<8x32xf32>
    %57 = arith.addf %54, %56 : vector<8x32xf32>
    %58 = arith.negf %57 : vector<8x32xf32>
    %59 = math.exp %58 : vector<8x32xf32>
    %cst_29 = arith.constant 1.000000e+00 : f32
    %60 = vector.broadcast %cst_29 : f32 to vector<8x32xf32>
    %61 = arith.addf %60, %59 : vector<8x32xf32>
    %62 = arith.divf %60, %61 : vector<8x32xf32>
    %63 = arith.mulf %62, %1 : vector<8x32xf32>
    %64 = arith.truncf %63 : vector<8x32xf32> to vector<8x32xbf16>
    %c0_30 = arith.constant 0 : index
    %c0_31 = arith.constant 0 : index
    %65 = vector.load %arg11[%c0_30, %c0_31] : memref<32x96xbf16, #tpu.memory_space<vmem>>, vector<32x96xbf16>
    %cst_32 = arith.constant dense<0.000000e+00> : vector<8x96xf32>
    %66 = tpu.matmul %64, %65, %cst_32 {dimension_numbers = #tpu.dot_dimension_numbers<[1], [0], [0], [1], [0, 0, 1, 1], [], []>} : vector<8x32xbf16>, vector<32x96xbf16>, vector<8x96xf32> -> vector<8x96xf32>
    %67 = arith.truncf %51 : vector<8x32xf32> to vector<8x32xbf16>
    %c0_33 = arith.constant 0 : index
    %c0_34 = arith.constant 0 : index
    %68 = vector.load %arg12[%c0_33, %c0_34] : memref<32x96xbf16, #tpu.memory_space<vmem>>, vector<32x96xbf16>
    %cst_35 = arith.constant dense<0.000000e+00> : vector<8x96xf32>
    %69 = tpu.matmul %67, %68, %cst_35 {dimension_numbers = #tpu.dot_dimension_numbers<[1], [0], [0], [1], [0, 0, 1, 1], [], []>} : vector<8x32xbf16>, vector<32x96xbf16>, vector<8x96xf32> -> vector<8x96xf32>
    %70 = arith.addf %66, %69 : vector<8x96xf32>
    %c0_36 = arith.constant 0 : index
    %c0_37 = arith.constant 0 : index
    %71 = vector.load %arg13[%c0_36, %c0_37] : memref<1x96xf32, #tpu.memory_space<vmem>>, vector<1x96xf32>
    %72 = vector.broadcast %71 : vector<1x96xf32> to vector<8x96xf32>
    %73 = arith.addf %70, %72 : vector<8x96xf32>
    %c0_38 = arith.constant 0 : index
    %c0_39 = arith.constant 0 : index
    %c0_40 = arith.constant 0 : index
    %74 = vector.load %arg14[%c0_38, %c0_39, %c0_40] : memref<1x8x96xf32, #tpu.memory_space<vmem>>, vector<1x8x96xf32>
    %75 = vector.shape_cast %74 : vector<1x8x96xf32> to vector<8x96xf32>
    %76 = vector.shape_cast %73 : vector<8x96xf32> to vector<1x8x96xf32>
    tpu.vector_store %arg14[%c0_38, %c0_39, %c0_40], %76 {strides = array<i32>} : memref<1x8x96xf32, #tpu.memory_space<vmem>>, vector<1x8x96xf32>,
    return
  }
  func.func @transform_0(%arg0: i32, %arg1: i32) -> (i32, i32, i32) {
    %c0_i32 = arith.constant 0 : i32
    %c0_i32_0 = arith.constant 0 : i32
    return %arg0, %arg1, %c0_i32 : i32, i32, i32
  }
  func.func @transform_1(%arg0: i32, %arg1: i32) -> (i32, i32, i32) {
    %c0_i32 = arith.constant 0 : i32
    %c0_i32_0 = arith.constant 0 : i32
    %c0_i32_1 = arith.constant 0 : i32
    return %arg0, %c0_i32, %c0_i32_0 : i32, i32, i32
  }
  func.func @transform_2(%arg0: i32, %arg1: i32) -> (i32, i32, i32) {
    %c0_i32 = arith.constant 0 : i32
    %c0_i32_0 = arith.constant 0 : i32
    %c0_i32_1 = arith.constant 0 : i32
    return %arg0, %c0_i32, %c0_i32_0 : i32, i32, i32
  }
  func.func @transform_3(%arg0: i32, %arg1: i32) -> (i32, i32) {
    %c0_i32 = arith.constant 0 : i32
    %c0_i32_0 = arith.constant 0 : i32
    %c0_i32_1 = arith.constant 0 : i32
    return %c0_i32, %c0_i32_0 : i32, i32
  }
  func.func @transform_4(%arg0: i32, %arg1: i32) -> (i32, i32) {
    %c0_i32 = arith.constant 0 : i32
    %c0_i32_0 = arith.constant 0 : i32
    %c0_i32_1 = arith.constant 0 : i32
    return %c0_i32, %c0_i32_0 : i32, i32
  }
  func.func @transform_5(%arg0: i32, %arg1: i32) -> (i32, i32) {
    %c0_i32 = arith.constant 0 : i32
    %c0_i32_0 = arith.constant 0 : i32
    %c0_i32_1 = arith.constant 0 : i32
    return %c0_i32, %c0_i32_0 : i32, i32
  }
  func.func @transform_6(%arg0: i32, %arg1: i32) -> (i32, i32) {
    %c0_i32 = arith.constant 0 : i32
    %c0_i32_0 = arith.constant 0 : i32
    %c0_i32_1 = arith.constant 0 : i32
    return %c0_i32, %c0_i32_0 : i32, i32
  }
  func.func @transform_7(%arg0: i32, %arg1: i32) -> (i32, i32) {
    %c0_i32 = arith.constant 0 : i32
    %c0_i32_0 = arith.constant 0 : i32
    %c0_i32_1 = arith.constant 0 : i32
    return %c0_i32, %c0_i32_0 : i32, i32
  }
  func.func @transform_8(%arg0: i32, %arg1: i32) -> (i32, i32) {
    %c0_i32 = arith.constant 0 : i32
    %c0_i32_0 = arith.constant 0 : i32
    %c0_i32_1 = arith.constant 0 : i32
    return %c0_i32, %c0_i32_0 : i32, i32
  }
  func.func @transform_9(%arg0: i32, %arg1: i32) -> (i32, i32) {
    %c0_i32 = arith.constant 0 : i32
    %c0_i32_0 = arith.constant 0 : i32
    %c0_i32_1 = arith.constant 0 : i32
    return %c0_i32, %c0_i32_0 : i32, i32
  }
  func.func @transform_10(%arg0: i32, %arg1: i32) -> (i32, i32) {
    %c0_i32 = arith.constant 0 : i32
    %c0_i32_0 = arith.constant 0 : i32
    %c0_i32_1 = arith.constant 0 : i32
    return %c0_i32, %c0_i32_0 : i32, i32
  }
  func.func @transform_11(%arg0: i32, %arg1: i32) -> (i32, i32) {
    %c0_i32 = arith.constant 0 : i32
    %c0_i32_0 = arith.constant 0 : i32
    %c0_i32_1 = arith.constant 0 : i32
    return %c0_i32, %c0_i32_0 : i32, i32
  }
  func.func @transform_12(%arg0: i32, %arg1: i32) -> (i32, i32, i32) {
    %c0_i32 = arith.constant 0 : i32
    %c0_i32_0 = arith.constant 0 : i32
    return %arg0, %arg1, %c0_i32 : i32, i32, i32
  }
}

</mosaic_0001>

<bundles_post_ra>
// kernel: tpu_custom_call.1
= control target key start
LH: loop header
LB: loop body
LE: loop exit
PB: predicated region body
PF: predicated region fallthrough
CT: control target
= control target key end

     0   :  { %s2732_s0 = inlined_call_operand.hbm [shape: f32[2,16,32], index: 0, kind: input, shape index: {}]   ;;  %s2733_s1 = inlined_call_operand.hbm [shape: f32[2,8,32], index: 1, kind: input, shape index: {}]   ;;  %s2734_s2 = inlined_call_operand.hbm [shape: f32[2,1,8], index: 2, kind: input, shape index: {}]   ;;  %s2735_s3 = inlined_call_operand.hbm [shape: bf16[32,64], index: 3, kind: input, shape index: {}]   ;;  %s2736_s4 = inlined_call_operand.hbm [shape: f32[1,64], index: 4, kind: input, shape index: {}]   ;;  %s2737_s5 = inlined_call_operand.hbm [shape: bf16[32,32], index: 5, kind: input, shape index: {}]   ;;  %s2738_s6 = inlined_call_operand.hbm [shape: f32[1,32], index: 6, kind: input, shape index: {}]   ;;  %s2739_s7 = inlined_call_operand.hbm [shape: bf16[32,32], index: 7, kind: input, shape index: {}]   ;;  %s2740_s8 = inlined_call_operand.hbm [shape: f32[1,32], index: 8, kind: input, shape index: {}]   ;;  %s2741_s9 = inlined_call_operand.vmem [shape: bf16[32,96], index: 9, kind: input, shape index: {}]   ;;  %s2742_s10 = inlined_call_operand.hbm [shape: bf16[32,96], index: 10, kind: input, shape index: {}]   ;;  %s2743_s11 = inlined_call_operand.vmem [shape: f32[1,96], index: 11, kind: input, shape index: {}]   ;;  %s2744_s12 = inlined_call_operand.hbm [shape: f32[2,16,96], index: 12, kind: output, shape index: {}]  }
   0x1   :  { %2767 = sst [smem:[#allocation36_spill]] %s2733_s1 }
   0x2   :  { %2768 = sst [smem:[#allocation37_spill]] %s2734_s2 }
   0x3   :  { %2769 = sst [smem:[#allocation38_spill]] %s2735_s3 }
   0x4   :  { %2770 = sst [smem:[#allocation39_spill]] %s2736_s4 }
   0x5   :  { %2771 = sst [smem:[#allocation40_spill]] %s2737_s5 }
   0x6   :  { %2772 = sst [smem:[#allocation41_spill]] %s2738_s6 }
   0x7   :  { %2773 = sst [smem:[#allocation42_spill]] %s2739_s7 }
   0x8   :  { %2774 = sst [smem:[#allocation43_spill]] %s2740_s8 }
   0x9   :  { %2775 = sst [smem:[#allocation44_spill]] %s2741_s9 }
   0xa   :  { %2776 = sst [smem:[#allocation45_spill]] %s2742_s10 }
   0xb   :  { %2777 = sst [smem:[#allocation46_spill]] %s2743_s11 }
   0xc   :  { %2778 = sst [smem:[#allocation47_spill]] %s2744_s12 }
   0xd   :  { %17 = vsyncpa [#allocation3], 0 }
   0xe   :  { %19 = vsyncpa [#allocation3 + $0x1], 0 }
   0xf   :  { %20 = vsyncpa [#allocation6], 0 }
  0x10   :  { %22 = vsyncpa [#allocation6 + $0x1], 0 }
  0x11   :  { %23 = vsyncpa [#allocation9], 0 }
  0x12   :  { %24 = vsyncpa [#allocation12], 0 }
  0x13   :  { %25 = vsyncpa [#allocation15], 0 }
  0x14   :  { %26 = vsyncpa [#allocation18], 0 }
  0x15   :  { %27 = vsyncpa [#allocation4], 0 }
  0x16   :  { %29 = vsyncpa [#allocation4 + $0x1], 0  ;;  %s2277_s21 = smov 0   ;;  %s2279_s22 = smov 0  }
  0x17   :  { %s2281_s23 = smov 0   ;;  %s2283_s24 = smov 0  }
  0x18   :  { %s2285_s25 = smov 0   ;;  %s2287_s26 = smov 0  }
  0x19   :  { %s2289_s27 = smov 0   ;;  %s2291_s28 = smov 0  }
  0x1a   :  { %s2293_s29 = smov 0   ;;  %s2295_s30 = smov 0  }
  0x1b   :  { %s2297_s13 = smov 0  }
  0x1c LB: > { %2779 = sst [smem:[#allocation27_spill]] %s2163_s24  ;;  %s2333_s14 = sadd.s32 4294967295, %s2191_s13   ;;  %s2191_s13 = sphi %s2297_s13, %s35_s13   ;;  %s2187_s30 = sphi %s2295_s30, %s2848_s30   ;;  %s2183_s29 = sphi %s2293_s29, %s2838_s29   ;;  %s2179_s28 = sphi %s2291_s28, %s2847_s28   ;;  %s2175_s27 = sphi %s2289_s27, %s2846_s27   ;;  %s2171_s26 = sphi %s2287_s26, %s2845_s26   ;;  %s2167_s25 = sphi %s2285_s25, %s2844_s25   ;;  %s2163_s24 = sphi %s2283_s24, %s2843_s24   ;;  %s2159_s23 = sphi %s2281_s23, %s2842_s23   ;;  %s2155_s22 = sphi %s2279_s22, %s2841_s22   ;;  %s2151_s21 = sphi %s2277_s21, %s2840_s21  }
  0x1d   : > { %2780 = sst [smem:[#allocation28_spill]] %s2175_s27  ;;  %p1440_p0 = scmp.ge.s32.totalorder %s2191_s13, 1 }
  0x1e   : > { %2781 = sst [smem:[#allocation29_spill]] %s2179_s28  ;;  %p2751_p1 = scmp.eq.s32.totalorder %s2333_s14, 0 }
  0x1f   : > { %2782 = sst [smem:[#allocation30_spill]] %s2183_s29  ;;  %p349_p2 = scmp.lt.s32.totalorder %s2191_s13, 5 }
  0x20   : > { %s2193_s16 = smov [#allocation8]   ;;  %s2194_s19 = smov [#allocation11]  }
  0x21   : > { %p2338_p3 = pnand %p1440_p0, %p349_p2  ;;  %s361_s17 = sshll.u32 %s2193_s16, 4  ;;  %s362_s17 = int_to_ptr.vmem [resolvable:$true] %s361_s17 }
  0x22   : > { %s385_s20 = sshll.u32 %s2194_s19, 4  ;;  %s2195_s12 = smov [#allocation14]   ;;  %s386_s20 = int_to_ptr.vmem [resolvable:$true] %s385_s20 }
  0x23   : > { %s2783_s15 = scalar_select %p2338_p3, 1, 0 }
  0x24   : > { %p1592_p4 = pneg %p2338_p3  ;;  %s409_s11 = sshll.u32 %s2195_s12, 4  ;;  %s410_s11 = int_to_ptr.vmem [resolvable:$true] %s409_s11 }
  0x25   : > { %2784 = sst [smem:[#allocation31_spill]] %s2783_s15  ;;  %s1796_s16 = scalar_lea.vmem %s362_s17, 256 }
  0x26   : > { %p2346_p5 = pnand %p1592_p4, %p2751_p1  ;;  %p1797_p7 = scmp.ne.s32.totalorder %s362_s17, %s1796_s16 }
  0x27   : > { %p1804_p10 = scmp.lt.s32.totalorder %s362_s17, %s362_s17  ;;  %p1805_p11 = scmp.lt.s32.totalorder %s1796_s16, %s1796_s16 }
  0x28   : > { %p2352_p6 = pneg %p2346_p5 }
  0x29   : > { %p1806_p12 = por %p1805_p11, %p1804_p10 }
  0x2a   : > { %p1799_p8 = pnand %p1797_p7, %p2352_p6 }
  0x2c   : > { %p1800_p9 = pneg %p1799_p8 }
  0x2e   : > { %p1807_p13 = pnand %p1806_p12, %p1800_p9 }
  0x30   : > { %1810 = shalt.err (!%p1807_p13)
}
  0x31   : > { %s2748_s19 = smov 64   ;;  %s2749_s12 = smov 4  }
  0x32   : > { %s2787_s3 = sld [smem:[#allocation38_spill]]  ;;  %s1822_s15 = scalar_lea.vmem %s386_s20, 256 }
  0x33   : > { %p1823_p0 = scmp.ne.s32.totalorder %s386_s20, %s1822_s15  ;;  %p1830_p7 = scmp.lt.s32.totalorder %s386_s20, %s386_s20 }
  0x34   : > { %p1831_p8 = scmp.lt.s32.totalorder %s1822_s15, %s1822_s15 }
  0x35   : > { %p1825_p2 = pnand %p1823_p0, %p2352_p6 }
  0x36   : > { %p1832_p9 = por %p1831_p8, %p1830_p7 }
  0x37   : > { %p1826_p4 = pneg %p1825_p2 }
  0x38   : > { %1595 = dma.hbm_to_vmem [thread:$0]  (!%p2346_p5), %s2787_s3, 256, %s362_s17, [#allocation9], %s2748_s19, %s2748_s19, %s2749_s12  }
  0x39   : > { %p1833_p10 = pnand %p1832_p9, %p1826_p4 }
  0x3b   : > { %1836 = shalt.err (!%p1833_p10)
}
  0x3c   : > { %s2788_s5 = sld [smem:[#allocation40_spill]]  ;;  %s1848_s9 = scalar_lea.vmem %s410_s11, 256 }
  0x3d   : > { %p1849_p11 = scmp.ne.s32.totalorder %s410_s11, %s1848_s9  ;;  %p1856_p0 = scmp.lt.s32.totalorder %s410_s11, %s410_s11 }
  0x3e   : > { %p1857_p2 = scmp.lt.s32.totalorder %s1848_s9, %s1848_s9 }
  0x3f   : > { %p1851_p12 = pnand %p1849_p11, %p2352_p6 }
  0x40   : > { %p1858_p4 = por %p1857_p2, %p1856_p0 }
  0x41   : > { %p1852_p13 = pneg %p1851_p12 }
  0x42   : > { %1601 = dma.hbm_to_vmem [thread:$0]  (!%p2346_p5), %s2788_s5, 256, %s386_s20, [#allocation12], %s2748_s19, %s2748_s19, %s2749_s12  }
  0x43   : > { %p1859_p7 = pnand %p1858_p4, %p1852_p13 }
  0x45   : > { %1862 = shalt.err (!%p1859_p7)
}
  0x46   : > { %s2789_s7 = sld [smem:[#allocation42_spill]]  ;;  %p2754_p8 = scmp.eq.s32.totalorder %s2191_s13, 0 }
  0x47   : > { %p89_p9 = scmp.ne.s32.totalorder %s2159_s23, %s2155_s22  ;;  %p95_p10 = scmp.ne.s32.totalorder %s2155_s22, %s2151_s21 }
  0x48   : > { %p2750_p11 = scmp.lt.s32.totalorder %s2191_s13, 4  ;;  %s473_s17 = sand.u32 1, %s2191_s13  }
  0x49   : > { %p91_p12 = por %p89_p9, %p2754_p8  ;;  %p2398_p13 = por %p95_p10, %p2751_p1 }
  0x4a   : > { %s2752_s16 = sand.u32 1, %s2159_s23   ;;  %s1453_s9 = sshll.u32 %s2187_s30, 7 }
  0x4b   : > { %s2790_s20 = scalar_select %p2398_p13, 1, 0 }
  0x4c   : > { %1607 = dma.hbm_to_vmem [thread:$0]  (!%p2346_p5), %s2789_s7, 256, %s410_s11, [#allocation15], %s2748_s19, %s2748_s19, %s2749_s12  }
  0x4d   : > { %s1452_s28 = sshll.u32 %s2752_s16, 3  ;;  %s2791_s1 = sld [smem:[#allocation36_spill]] }
  0x4e   : > { %p2411_p0 = pnand %p2750_p11, %p91_p12  ;;  %s477_s15 = scalar_lea.vmem [#allocation5], %s1452_s28 }
  0x4f   : > { %s484_s19 = sshll.u32 %s477_s15, 4  ;;  %s2415_s12 = scalar_lea.sflag [#allocation6], %s473_s17  ;;  %s485_s19 = int_to_ptr.vmem [resolvable:$true] %s484_s19 }
  0x50   : > { %s2792_s21 = scalar_select %p2411_p0, 1, 0 }
  0x51   : > { %p2753_p2 = pneg %p2411_p0  ;;  %s1876_s5 = scalar_lea.vmem %s485_s19, 128 }
  0x52   : > { %p1877_p4 = scmp.ne.s32.totalorder %s485_s19, %s1876_s5  ;;  %s2198_s3 = smov [#allocation5]  }
  0x53   : > { %s482_s11 = scalar_lea.hbm %s2791_s1, %s1453_s9  ;;  %s1881_s9 = sshll.u32 %s2198_s3, 4  ;;  %s1882_s9 = int_to_ptr.vmem [resolvable:$false] %s1881_s9 }
  0x54   : > { %p1879_p7 = pnand %p1877_p4, %p2753_p2  ;;  %s1883_s2 = scalar_lea.vmem %s1882_s9, 256 }
  0x55   : > { %p1884_p10 = scmp.lt.s32.totalorder %s485_s19, %s1882_s9  ;;  %p1885_p12 = scmp.lt.s32.totalorder %s1883_s2, %s1876_s5 }
  0x56   : > { %p1880_p9 = pneg %p1879_p7 }
  0x57   : > { %p1886_p11 = por %p1885_p12, %p1884_p10 }
  0x59   : > { %p1887_p1 = pnand %p1886_p11, %p1880_p9 }
  0x5b   : > { %1890 = shalt.err (!%p1887_p1)
}
  0x5c   : > { %1620 = dma.hbm_to_vmem [thread:$0]  (!%p2411_p0), %s482_s11, 128, %s485_s19, %s2415_s12  }
  0x5d   : > { %s2199_s15 = smov [#allocation10]   ;;  %s2200_s28 = smov [#allocation13]  }
  0x5e   : > { %s375_s17 = sshll.u32 %s2199_s15, 4  ;;  %s399_s16 = sshll.u32 %s2200_s28, 4  ;;  %s376_s17 = int_to_ptr.vmem [resolvable:$true] %s375_s17  ;;  %s400_s16 = int_to_ptr.vmem [resolvable:$true] %s399_s16 }
  0x5f   : > { %s1902_s1 = scalar_lea.vmem %s376_s17, 16  ;;  %s1909_s3 = scalar_lea.vmem %s376_s17, 32 }
  0x60   : > { %p1903_p4 = scmp.ne.s32.totalorder %s376_s17, %s1902_s1  ;;  %p1910_p8 = scmp.lt.s32.totalorder %s376_s17, %s376_s17 }
  0x61   : > { %p1911_p10 = scmp.lt.s32.totalorder %s1909_s3, %s1902_s1 }
  0x62   : > { %p1905_p7 = pnand %p1903_p4, %p2352_p6 }
  0x63   : > { %p1912_p11 = por %p1911_p10, %p1910_p8 }
  0x64   : > { %p1906_p2 = pneg %p1905_p7 }
  0x66   : > { %p1913_p1 = pnand %p1912_p11, %p1906_p2 }
  0x68   : > { %1916 = shalt.err (!%p1913_p1)
}
  0x69   : > { %s2793_s4 = sld [smem:[#allocation39_spill]]  ;;  %s1928_s11 = scalar_lea.vmem %s400_s16, 16 }
  0x6a   : > { %p1929_p9 = scmp.ne.s32.totalorder %s400_s16, %s1928_s11  ;;  %s1935_s9 = scalar_lea.vmem %s400_s16, 32 }
  0x6b   : > { %p1936_p7 = scmp.lt.s32.totalorder %s400_s16, %s400_s16  ;;  %p1937_p13 = scmp.lt.s32.totalorder %s1935_s9, %s1928_s11 }
  0x6c   : > { %p1931_p12 = pnand %p1929_p9, %p2352_p6 }
  0x6d   : > { %p1938_p3 = por %p1937_p13, %p1936_p7 }
  0x6e   : > { %p1932_p4 = pneg %p1931_p12 }
  0x6f   : > { %1598 = dma.hbm_to_vmem [thread:$0]  (!%p2346_p5), %s2793_s4, 16, %s376_s17, [#allocation9]  }
  0x70   : > { %p1939_p8 = pnand %p1938_p3, %p1932_p4 }
  0x72   : > { %1942 = shalt.err (!%p1939_p8)
}
  0x73   : > { %s2794_s6 = sld [smem:[#allocation41_spill]]  ;;  %s2201_s15 = smov [#allocation16]  }
  0x74   : > { %s423_s17 = sshll.u32 %s2201_s15, 4  ;;  %s2202_s28 = smov [#allocation17]   ;;  %s424_s17 = int_to_ptr.vmem [resolvable:$true] %s423_s17 }
  0x75   : > { %s436_s3 = sshll.u32 %s2202_s28, 4  ;;  %s1954_s5 = scalar_lea.vmem %s424_s17, 16  ;;  %s437_s3 = int_to_ptr.vmem [resolvable:$true] %s436_s3 }
  0x76   : > { %p1955_p2 = scmp.ne.s32.totalorder %s424_s17, %s1954_s5  ;;  %s1961_s19 = scalar_lea.vmem %s424_s17, 32 }
  0x77   : > { %p1962_p3 = scmp.lt.s32.totalorder %s424_s17, %s424_s17  ;;  %p1963_p13 = scmp.lt.s32.totalorder %s1961_s19, %s1954_s5 }
  0x78   : > { %p1957_p10 = pnand %p1955_p2, %p2352_p6 }
  0x79   : > { %1604 = dma.hbm_to_vmem [thread:$0]  (!%p2346_p5), %s2794_s6, 16, %s400_s16, [#allocation12]  }
  0x7a   : > { %p1958_p11 = pneg %p1957_p10  ;;  %p1964_p1 = por %p1963_p13, %p1962_p3 }
  0x7c   : > { %p1965_p9 = pnand %p1964_p1, %p1958_p11 }
  0x7e   : > { %1968 = shalt.err (!%p1965_p9)
}
  0x7f   : > { %s2795_s8 = sld [smem:[#allocation43_spill]]  ;;  %s1980_s9 = scalar_lea.vmem %s437_s3, 256 }
  0x80   : > { %p1981_p12 = scmp.ne.s32.totalorder %s437_s3, %s1980_s9  ;;  %p1988_p8 = scmp.lt.s32.totalorder %s437_s3, %s437_s3 }
  0x81   : > { %p1989_p2 = scmp.lt.s32.totalorder %s1980_s9, %s1980_s9 }
  0x82   : > { %p1983_p4 = pnand %p1981_p12, %p2352_p6 }
  0x83   : > { %p1990_p10 = por %p1989_p2, %p1988_p8 }
  0x84   : > { %p1984_p7 = pneg %p1983_p4 }
  0x85   : > { %1610 = dma.hbm_to_vmem [thread:$0]  (!%p2346_p5), %s2795_s8, 16, %s424_s17, [#allocation15]  }
  0x86   : > { %p1991_p0 = pnand %p1990_p10, %p1984_p7 }
  0x88   : > { %1994 = shalt.err (!%p1991_p0)
}
  0x89   : > { %s2796_s1 = smov 4   ;;  %s2797_s2 = smov 64  }
  0x8a   : > { %s2798_s10 = sld [smem:[#allocation45_spill]]  ;;  %s1439_s27 = sadd.s32 4294967294, %s2191_s13  }
  0x8b   : > { %s44_s18 = sadd.s32 1, %s2183_s29  ;;  %s47_s17 = sadd.s32 1, %s2187_s30 }
  0x8c   : > { %p45_p6 = scmp.ge.s32.totalorder %s44_s18, 2  ;;  %s56_s5 = sadd.s32 1, %s2171_s26 }
  0x8d   : > { %p63_p0 = scmp.ne.s32.totalorder %s2171_s26, %s2167_s25  ;;  %p69_p11 = scmp.ne.s32.totalorder %s2167_s25, %s2163_s24 }
  0x8e   : > { %s2850_s18 = smov (%p45_p6, %s44_s18), 0  ;;  %s2852_s17 = smov (!%p45_p6, %s47_s17), %s2187_s30 }
  0x8f   : > { %2799 = sst [smem:[#allocation32_spill]] %s2850_s18  ;;  %s52_s19 = ssub.s32 %s2183_s29, %s2850_s18 }
  0x90   : > { %1613 = dma.hbm_to_vmem [thread:$0]  (!%p2346_p5), %s2798_s10, 256, %s437_s3, [#allocation18], %s2797_s2, %s2797_s2, %s2796_s1  }
  0x91   : > { %p2800_p3 = scmp.eq.s32.totalorder %s2191_s13, 0  ;;  %p49_p5 = scmp.ge.s32.totalorder %s2852_s17, 2 }
  0x92   : > { %p2802_p1 = scmp.eq.s32.totalorder %s2333_s14, 0  ;;  %p336_p12 = scmp.eq.s32.totalorder %s2333_s14, 3 }
  0x93   : > { %p2471_p13 = por %p2800_p3, %p63_p0  ;;  %p342_p4 = scmp.eq.s32.totalorder %s1439_s27, 3 }
  0x94   : > { %p2477_p9 = por %p2802_p1, %p69_p11  ;;  %s2854_s17 = smov (%p49_p5, %s2852_s17), 0 }
  0x95   : > { %2804 = sst [smem:[#allocation33_spill]] %s2854_s17  ;;  %p2484_p7 = por %p336_p12, %p63_p0 }
  0x96   : > { %p2488_p8 = por %p342_p4, %p69_p11  ;;  %s51_s1 = ssub.s32 %s2187_s30, %s2854_s17 }
  0x97   : > { %s2805_s16 = scalar_select %p2484_p7, 1, 0 }
  0x98   : > { %s2807_s9 = scalar_select %p2488_p8, 1, 0 }
  0x99   : > { %2806 = sst [smem:[#allocation34_spill]] %s2805_s16  ;;  %s453_s2 = sand.u32 1, %s2171_s26  }
  0x9a   : > { %2808 = sst [smem:[#allocation35_spill]] %s2807_s9  ;;  %s53_s15 = sor.u32 %s52_s19, %s51_s1 }
  0x9b   : > { %p80_p2 = scmp.eq.s32.totalorder %s51_s1, 0  ;;  %p54_p10 = scmp.eq.s32.totalorder %s53_s15, 0 }
  0x9c   : > { %s2809_s28 = sadd.s32 1, %s2159_s23  ;;  %s1449_s6 = sshll.u32 %s453_s2, 3 }
  0x9d   : > { %s2498_s27 = scalar_select %p80_p2, %s2159_s23, %s2809_s28  }
  0x9e   : > { %s2501_s4 = scalar_select %p54_p10, %s2171_s26, %s56_s5  }
  0x9f   : > { %s1450_s7 = sshll.u32 %s2187_s30, 1  ;;  %s457_s18 = scalar_lea.vmem [#allocation2], %s1449_s6 }
  0xa0   : > { %s462_s8 = sadd.s32 %s2183_s29, %s1450_s7  ;;  %s466_s9 = sshll.u32 %s457_s18, 4  ;;  %s467_s9 = int_to_ptr.vmem [resolvable:$true] %s466_s9 }
  0xa1   : > { %s1451_s10 = sshll.u32 %s462_s8, 7  ;;  %p2810_p6 = scmp.lt.s32.totalorder %s2191_s13, 4 }
  0xa2   : > { %s464_s17 = scalar_lea.hbm %s2732_s0, %s1451_s10  ;;  %s1454_s5 = sshll.u32 %s2187_s30, 4 }
  0xa3   : > { %p2512_p0 = pnand %p2810_p6, %p2471_p13  ;;  %s2812_s1 = sand.u32 1, %s2159_s23  }
  0xa4   : > { %s494_s15 = scalar_lea.vmem [#allocation7], %s2812_s1  ;;  %s2813_s6 = sld [smem:[#allocation37_spill]] }
  0xa5   : > { %s501_s28 = sshll.u32 %s494_s15, 4  ;;  %s454_s29 = scalar_lea.sflag [#allocation3], %s453_s2  ;;  %s502_s28 = int_to_ptr.vmem [resolvable:$true] %s501_s28 }
  0xa6   : > { %p1997_p11 = pneg %p2512_p0  ;;  %s2008_s10 = scalar_lea.vmem %s467_s9, 128 }
  0xa7   : > { %p2009_p3 = scmp.ne.s32.totalorder %s467_s9, %s2008_s10  ;;  %s2203_s24 = smov [#allocation2]  }
  0xa8   : > { %s2013_s3 = sshll.u32 %s2203_s24, 4  ;;  %s2014_s3 = int_to_ptr.vmem [resolvable:$false] %s2013_s3 }
  0xa9   : > { %p2011_p5 = pnand %p2009_p3, %p1997_p11  ;;  %s2015_s16 = scalar_lea.vmem %s2014_s3, 256 }
  0xaa   : > { %s2522_s18 = scalar_lea.hbm %s2813_s6, %s1454_s5  ;;  %p2016_p1 = scmp.lt.s32.totalorder %s467_s9, %s2014_s3 }
  0xab   : > { %p2012_p13 = pneg %p2011_p5  ;;  %p2017_p12 = scmp.lt.s32.totalorder %s2015_s16, %s2008_s10 }
  0xad   : > { %p2018_p4 = por %p2017_p12, %p2016_p1 }
  0xaf   : > { %p2019_p2 = pnand %p2018_p4, %p2012_p13 }
  0xb1   : > { %2022 = shalt.err (!%p2019_p2)
}
  0xb2   : > { %1617 = dma.hbm_to_vmem [thread:$0]  (!%p2512_p0), %s464_s17, 128, %s467_s9, %s454_s29  }
  0xb3   : > { %s2036_s2 = scalar_lea.vmem %s502_s28, 16  ;;  %p2814_p6 = scmp.ne.s32.totalorder %s2792_s21, 0 }
  0xb4   : > { %p2037_p10 = scmp.ne.s32.totalorder %s502_s28, %s2036_s2  ;;  %s2204_s5 = smov [#allocation7]  }
  0xb5   : > { %p2815_p8 = pneg %p2814_p6  ;;  %s2041_s1 = sshll.u32 %s2204_s5, 4  ;;  %s2042_s1 = int_to_ptr.vmem [resolvable:$false] %s2041_s1 }
  0xb6   : > { %s2043_s15 = scalar_lea.vmem %s2042_s1, 32  ;;  %p2044_p5 = scmp.lt.s32.totalorder %s502_s28, %s2042_s1 }
  0xb7   : > { %p2039_p11 = pnand %p2037_p10, %p2815_p8  ;;  %p2045_p7 = scmp.lt.s32.totalorder %s2043_s15, %s2036_s2 }
  0xb9   : > { %p2040_p3 = pneg %p2039_p11  ;;  %p2046_p1 = por %p2045_p7, %p2044_p5 }
  0xbb   : > { %p2047_p13 = pnand %p2046_p1, %p2040_p3 }
  0xbd   : > { %2050 = shalt.err (!%p2047_p13)
}
  0xbe   : > { %1623 = dma.hbm_to_vmem [thread:$0]  (!%p2814_p6), %s2522_s18, 16, %s502_s28, %s2415_s12  }
  0xbf   : > { %s2816_s29 = sld [smem:[#allocation31_spill]] }
  0xc5   : > { %p2817_p0 = scmp.ne.s32.totalorder %s2816_s29, 0 }
  0xc6   : > { %s2538_s17 = sand.u32 (!%p2817_p0), 1, %s2167_s25  }
  0xc7   : > { %510 = sbr.rel (%p2817_p0) target bundleno = 1562 (0x61a), region = 68  ;;  %s1456_s9 = sshll.u32 (!%p2817_p0), %s2538_s17, 3 }
  0xc8   : > { %s513_s19 = scalar_lea.sflag (!%p2817_p0), [#allocation3], %s2538_s17  ;;  %s2544_s7 = scalar_lea.vmem (!%p2817_p0), [#allocation2], %s1456_s9 }
  0xcc   : > { %2122 = dma.done.wait (%p2477_p9), %s513_s19, 128  }
  0xcd   : > { %2124 = vsyncadd (%p2477_p9), %s513_s19, 4294967168  ;;  %s521_s12 = sand.u32 1, %s2333_s14   ;;  %s523_s21 = sand.u32 1, %s2155_s22  }
  0xce   : > { %s2552_s28 = sshll.u32 %s523_s21, 3  ;;  %s522_s8 = scalar_lea.sflag [#allocation6], %s521_s12 }
  0xcf   : > { %s525_s6 = scalar_lea.vmem [#allocation5], %s2552_s28  ;;  %p2818_p7 = scmp.ne.s32.totalorder %s2790_s20, 0 }
  0xd1   : > { %2126 = dma.done.wait (%p2818_p7), %s522_s8, 144  }
  0xd2   : > { %2128 = vsyncadd (%p2818_p7), %s522_s8, 4294967152  ;;  %s2559_s18 = scalar_lea.vmem [#allocation7], %s523_s21  ;;  %p2819_p8 = scmp.eq.s32.totalorder %s2333_s14, 0 }
  0xd4   : > { %2130 = dma.done.wait (%p2819_p8), [#allocation9], 272   ;;  %p2820_p9 = pmov %p2819_p8 }
  0xd5   : > { %p2821_p12 = pmov %p2819_p8 }
  0xd6   : > { %2132 = vsyncadd (%p2820_p9), [#allocation9], 4294967024 }
  0xd7   : > { %2134 = dma.done.wait (%p2821_p12), [#allocation12], 272   ;;  %p2822_p4 = pmov %p2819_p8 }
  0xd9   : > { %2136 = vsyncadd (%p2822_p4), [#allocation12], 4294967024  ;;  %p2823_p2 = pmov %p2822_p4 }
  0xdb   : > { %2138 = dma.done.wait (%p2823_p2), [#allocation15], 272   ;;  %p2824_p10 = pmov %p2823_p2 }
  0xdc   : > { %p2825_p6 = pmov %p2823_p2 }
  0xdd   : > { %2140 = vsyncadd (%p2824_p10), [#allocation15], 4294967024 }
  0xde   : > { %2142 = dma.done.wait (%p2825_p6), [#allocation18], 256   ;;  %p2826_p11 = pmov %p2823_p2 }
  0xdf   : > { %v2205_v0 = vmov 0.0   ;;  %vm2206_vm0 = vmmov 0   ;;  %v1747_v1 = vld [vmem:[#allocation8 + $0x8] sm:$0xff]   ;;  %v1748_v2 = vld [vmem:[#allocation11 + $0x8] sm:$0xff]   ;;  %vm640_vm1 = vcmask 261120   ;;  %v1750_v5 = vld [vmem:[#allocation11] sm:$0xff]   ;;  %v754_v9 = vlaneseq }
  0xe0   : > { %2144 = vsyncadd (%p2826_p11), [#allocation18], 4294967040  ;;  %1510 = vmatprep.subr.bf16.mxu0 %v2205_v0  ;;  %1518 = vmatprep.subr.bf16.mxu1 %v2205_v0  ;;  %v1749_v3 = vld [vmem:[#allocation8] sm:$0xff]   ;;  %v613_v6 = vld [vmem:[%s525_s6] sm:$0xff]  ;;  %v2207_v13 = vmov 1966171168  }
  0xe1   : > { %1514 = vmatprep.mubr.msk.bf16.mxu0 %vm2206_vm0, %v2205_v0  ;;  %1522 = vmatprep.mubr.msk.bf16.mxu1 %vm2206_vm0, %v2205_v0  ;;  %v2585_v4 = vld [vmem:[%s2544_s7] sm:$0xff]  ;;  %v2590_v8 = vpack.c.bf16 %v613_v6, %v613_v6  ;;  %v755_v10 = vshrl.u32 %v754_v9, 7  ;;  %v910_v11 = vand.u32 127, %v754_v9  ;;  %v752_v14 = vunpack.c.l.s4 %v2207_v13  ;;  %v1466_v16 = vld [vmem:[#allocation10] ss:$0 sm:$0xff]  ;;  %s2209_s14 = smov 32  }
  0xe2   : > { %1511 = vmatpush3.bf16.msra.mxu0 %v1747_v1  ;;  %1519 = vmatpush3.bf16.msra.mxu1 %v1748_v2  ;;  %v615_v7 = vpack.c.bf16 %v2585_v4, %v2585_v4  ;;  %v1474_v57 = vld [vmem:[#allocation13] ss:$0 sm:$0xff]  ;;  %vm943_vm2 = vcmask 1041409   ;;  %vm945_vm3 = vcmask 1042434   ;;  %vm947_vm5 = vcmask 1043459   ;;  %s2827_s10 = sld [smem:[#allocation44_spill]] }
  0xe3   : > { %1512 = vmatprep.subr.bf16.mxu0 %v2205_v0  ;;  %1520 = vmatprep.subr.bf16.mxu1 %v2205_v0  ;;  %v2601_v12 = vsub.s32 %v910_v11, %v755_v10  ;;  %v753_v15 = vunpack.c.0.s8 %v752_v14  ;;  %v2608_v25 = vsub.s32 0, %v755_v10  ;;  %vm949_vm6 = vcmask 1044484   ;;  %s2210_s16 = smov 96   ;;  %s2828_s2 = sld [smem:[#allocation29_spill]] }
  0xe4   : > { %vm951_vm7 = vcmask 1045509   ;;  %vm953_vm8 = vcmask 1046534   ;;  %vm955_vm9 = vcmask 1047559   ;;  %vm959_vm11 = vcmask 64512   ;;  %s2829_s5 = sld [smem:[#allocation28_spill]]  ;;  %s610_s21 = scalar_lea.vmem [#allocation19], %s1456_s9 }
  0xe5   : > { %v756_v17 = vsub.s32 %v753_v15, %v755_v10  ;;  %vm975_vm12 = vcmask 1043456   ;;  %s2830_s7 = sld [smem:[#allocation46_spill]]  ;;  %s1246_s28 = sshll.u32 %s610_s21, 4  ;;  %vm1228_vm13 = vcmask 785408   ;;  %s2672_s28 = int_to_ptr.vmem [resolvable:$true] %s1246_s28 }
  0xe6   : > { %1513 = vmatpush3.bf16.msra.mxu0 %v1749_v3  ;;  %1521 = vmatpush3.bf16.msra.mxu1 %v1750_v5  ;;  %s2831_s8 = sld [smem:[#allocation34_spill]]  ;;  %s1231_s9 = scalar_lea.sflag [#allocation4], %s2538_s17 }
  0xe7   : > { %1526 = vmatprep.subr.bf16.mxu0 %v2205_v0  ;;  %1532 = vmatprep.subr.bf16.mxu1 %v2205_v0  ;;  %s2051_s11 = scalar_lea.vmem %s2672_s28, 128  ;;  %s2211_s24 = smov [#allocation19]  }
  0xe8   : > { %p2052_p3 = scmp.ne.s32.totalorder %s2672_s28, %s2051_s11  ;;  %s2055_s3 = sshll.u32 %s2211_s24, 4  ;;  %s2056_s3 = int_to_ptr.vmem [resolvable:$false] %s2055_s3 }
  0xe9   : > { %1515 = vmatmul.mubr.msk.bf16.vlgmr.msra.gmra.mxu0 %vm640_vm1, %v615_v7  ;;  %1523 = vmatmul.mubr.msk.bf16.vlgmr.msra.gmra.mxu1 %vm640_vm1, %v2590_v8  ;;  %s1489_s1 = sshll.u32 %s2828_s2, 1  ;;  %p2058_p0 = scmp.lt.s32.totalorder %s2672_s28, %s2056_s3 }
  0xea   : > { %1528 = vmatprep.mubr.msk.bf16.mxu0 %vm2206_vm0, %v2205_v0  ;;  %1536 = vmatprep.mubr.msk.bf16.mxu1 %vm2206_vm0, %v2205_v0  ;;  %s1242_s15 = sadd.s32 %s2829_s5, %s1489_s1 }
  0xeb   : > { %s1490_s12 = sshll.u32 %s1242_s15, 7 }
  0xec   : > { %p2833_p5 = scmp.ne.s32.totalorder %s2831_s8, 0 }
  0xee   : > { %p2053_p1 = pnand %p2052_p3, %p2833_p5 }
  0xf0   : > { %p2054_p13 = pneg %p2053_p1 }
 0x1a9   : > { %v678_v18 = vpop.f32.mrf.mxu0  ;;  %v743_v20 = vpop.f32.mrf.mxu1 }
 0x1aa   : > { %v2603_v19 = vadd.f32 %v1466_v16, %v678_v18 }
 0x1ab   : > { %v1516_v21 = vpop.f32.mrf.mxu0  ;;  %v1524_v24 = vpop.f32.mrf.mxu1 }
 0x1ac   : > { %v750_v22 = vcombine.high %v2603_v19, %v2603_v19  ;;  %v757_v23 = vrot.slane %v2603_v19, %v756_v17 }
 0x1ad   : > { %v681_v26 = vpop.f32.mrf.mxu0  ;;  %v746_v30 = vpop.f32.mrf.mxu1 }
 0x1ae   : > { %v764_v27 = vrot.slane %v750_v22, %v756_v17  ;;  %v765_v28 = vcombine.high %v757_v23, %v757_v23  ;;  %v773_v29 = vrot.slane %v757_v23, %v756_v17  ;;  %v614_v26 = vld [vmem:[%s2559_s18] sm:$0x1] }
 0x1af   : > { %v1517_v31 = vpop.f32.mrf.mxu0  ;;  %v1525_v36 = vpop.f32.mrf.mxu1  ;;  %vm894_vm4 = vcmp.gt.f32.partialorder %v614_v26, 0.0 }
 0x1b0   : > { %v766_v32 = vcombine.high %v764_v27, %v764_v27  ;;  %v780_v33 = vrot.slane %v764_v27, %v756_v17  ;;  %v787_v34 = vrot.slane %v765_v28, %v756_v17  ;;  %v795_v35 = vcombine.high %v773_v29, %v773_v29 }
 0x1b1   : > { %v802_v37 = vrot.slane %v773_v29, %v2608_v25  ;;  %v2208_v36 = vmov 0  }
 0x1b2   : > { %v794_v38 = vrot.slane %v766_v32, %v756_v17  ;;  %v796_v39 = vcombine.high %v780_v33, %v780_v33  ;;  %v797_v40 = vcombine.high %v787_v34, %v787_v34  ;;  %v806_v41 = vrot.slane %v787_v34, %v2608_v25 }
 0x1b3   : > { %v810_v42 = vrot.slane %v795_v35, %v2608_v25  ;;  %v818_v43 = vrot.slane %v780_v33, %v2608_v25  ;;  %v839_v44 = vadd.f32 %v802_v37, %v743_v20  ;;  %v895_v37 = vsel %vm894_vm4, 1, %v2208_v36 }
 0x1b4   : > { %v798_v45 = vcombine.high %v794_v38, %v794_v38  ;;  %v814_v46 = vrot.slane %v797_v40, %v2608_v25  ;;  %v822_v47 = vrot.slane %v794_v38, %v2608_v25  ;;  %v826_v48 = vrot.slane %v796_v39, %v2608_v25 }
 0x1b5   : > { %1757 = vtanh.f32 %v839_v44  ;;  %v841_v49 = vadd.f32 %v810_v42, %v743_v20  ;;  %v840_v50 = vadd.f32 %v806_v41, %v743_v20  ;;  %v843_v52 = vadd.f32 %v818_v43, %v743_v20 }
 0x1b6   : > { %v842_v51 = vadd.f32 %v814_v46, %v743_v20  ;;  %v830_v53 = vrot.slane %v798_v45, %v2608_v25  ;;  %v844_v54 = vadd.f32 %v822_v47, %v743_v20  ;;  %v845_v55 = vadd.f32 %v826_v48, %v743_v20 }
 0x1b7   : > { %1759 = vtanh.f32 %v841_v49  ;;  %v899_v43 = vrot.slane %v895_v37, %v2608_v25 }
 0x1b8   : > { %1761 = vtanh.f32 %v840_v50  ;;  %v846_v56 = vadd.f32 %v830_v53, %v743_v20 }
 0x1b9   : > { %1763 = vtanh.f32 %v842_v51  ;;  %vm900_vm10 = vcmp.eq.s32.totalorder %v899_v43, 1 }
 0x1ba   : > { %1765 = vtanh.f32 %v843_v52 }
 0x1bb   : > { %1767 = vtanh.f32 %v844_v54 }
 0x1bc   : > { %1769 = vtanh.f32 %v845_v55 }
 0x1bd   : > { %1771 = vtanh.f32 %v846_v56 }
 0x1c2   : > { %v1758_v58 = vpop.eup %1757 }
 0x1c3   : > { %v862_v59 = vmul.f32 %v1758_v58, %v1474_v57 }
 0x1c4   : > { %v1760_v60 = vpop.eup %1759 }
 0x1c5   : > { %v1762_v61 = vpop.eup %1761  ;;  %v870_v62 = vsel %vm640_vm1, %v862_v59, 0.0  ;;  %v864_v63 = vmul.f32 %v1760_v60, %v1474_v57 }
 0x1c6   : > { %v1764_v1 = vpop.eup %1763  ;;  %871 = vadd.xlane.f32.xlu0 %v870_v62  ;;  %v863_v2 = vmul.f32 %v1762_v61, %v1474_v57  ;;  %v1752_v62 = vld [vmem:[#allocation14] sm:$0xff]  }
 0x1c7   : > { %v1766_v3 = vpop.eup %1765  ;;  %v876_v5 = vsel %vm640_vm1, %v864_v63, 0.0  ;;  %v865_v6 = vmul.f32 %v1764_v1, %v1474_v57 }
 0x1c8   : > { %v1768_v7 = vpop.eup %1767  ;;  %877 = vadd.xlane.f32.xlu1 %v876_v5  ;;  %v873_v9 = vsel %vm640_vm1, %v863_v2, 0.0  ;;  %v866_v10 = vmul.f32 %v1766_v3, %v1474_v57  ;;  %v1470_v5 = vmul.f32 -1.442695, %v2603_v19 }
 0x1c9   : > { %v1770_v11 = vpop.eup %1769  ;;  %v879_v13 = vsel %vm640_vm1, %v865_v6, 0.0  ;;  %v867_v14 = vmul.f32 %v1768_v7, %v1474_v57  ;;  %v1753_v6 = vld [vmem:[#allocation17 + $0x8] sm:$0xff]   ;;  %v1754_v7 = vld [vmem:[%s2827_s10 + $0x8] sm:$0xff]  }
 0x1ca   : > { %874 = vadd.xlane.f32.xlu0 %v873_v9  ;;  %v1772_v15 = vpop.eup %1771  ;;  %v882_v16 = vsel %vm640_vm1, %v866_v10, 0.0  ;;  %v868_v17 = vmul.f32 %v1770_v11, %v1474_v57  ;;  %v1755_v9 = vld [vmem:[#allocation17] sm:$0xff]   ;;  %v1756_v10 = vld [vmem:[%s2827_s10] sm:$0xff]  }
 0x1cb   : > { %v885_v18 = vsel %vm640_vm1, %v867_v14, 0.0  ;;  %v869_v20 = vmul.f32 %v1772_v15, %v1474_v57  ;;  %v976_v57 = vsel %vm975_vm12, %v2590_v8, 0 }
 0x1cc   : > { %880 = vadd.xlane.f32.xlu1 %v879_v13  ;;  %v888_v21 = vsel %vm640_vm1, %v868_v17, 0.0  ;;  %1527 = vmatpush3.bf16.msra.mxu0 %v976_v57  ;;  %v1476_v17 = vld [vmem:[#allocation16] ss:$0 sm:$0xff] }
 0x1cd   : > { %v891_v22 = vsel %vm640_vm1, %v869_v20, 0.0  ;;  %1540 = vmatprep.subr.bf16.mxu0 %v2205_v0 }
 0x1ce   : > { %883 = vadd.xlane.f32.xlu0 %v882_v16 }
 0x1d0   : > { %886 = vadd.xlane.f32.xlu1 %v885_v18 }
 0x1d2   : > { %889 = vadd.xlane.f32.xlu0 %v888_v21 }
 0x1d4   : > { %892 = vadd.xlane.f32.xlu1 %v891_v22 }
 0x24f   : > { %v872_v23 = vpop.xlane.xlu0 %871 }
 0x250   : > { %v914_v28 = vrot.slane %v872_v23, %v2601_v12 }
 0x251   : > { %v878_v24 = vpop.xlane.xlu1 %877 }
 0x252   : > { %v922_v30 = vrot.slane %v878_v24, %v2601_v12 }
 0x253   : > { %v875_v27 = vpop.xlane.xlu0 %874 }
 0x254   : > { %v918_v29 = vrot.slane %v875_v27, %v2601_v12 }
 0x255   : > { %v881_v31 = vpop.xlane.xlu1 %880 }
 0x256   : > { %v944_v32 = vsel %vm943_vm2, %v918_v29, %v914_v28  ;;  %v926_v33 = vrot.slane %v881_v31, %v2601_v12 }
 0x257   : > { %v946_v34 = vsel %vm945_vm3, %v922_v30, %v944_v32  ;;  %v884_v35 = vpop.xlane.xlu0 %883 }
 0x258   : > { %v948_v38 = vsel %vm947_vm5, %v926_v33, %v946_v34  ;;  %v930_v39 = vrot.slane %v884_v35, %v2601_v12  ;;  %v1487_v33 = vld [vmem:[%s2830_s7] ss:$0 sm:$0xff] }
 0x259   : > { %v887_v40 = vpop.xlane.xlu1 %886 }
 0x25a   : > { %v950_v41 = vsel %vm949_vm6, %v930_v39, %v948_v38  ;;  %v934_v42 = vrot.slane %v887_v40, %v2601_v12 }
 0x25b   : > { %v890_v44 = vpop.xlane.xlu0 %889 }
 0x25c   : > { %v952_v45 = vsel %vm951_vm7, %v934_v42, %v950_v41  ;;  %v938_v46 = vrot.slane %v890_v44, %v2601_v12 }
 0x25d   : > { %v893_v47 = vpop.xlane.xlu1 %892 }
 0x25e   : > { %v942_v48 = vrot.slane %v893_v47, %v2601_v12  ;;  %v954_v49 = vsel %vm953_vm8, %v938_v46, %v952_v45  ;;  %v1751_v12 = vld [vmem:[#allocation14 + $0x8] sm:$0xff]  }
 0x25f   : > { %1533 = vmatpush3.bf16.msra.mxu1 %v1751_v12 }
 0x260   : > { %v956_v50 = vsel %vm955_vm9, %v942_v48, %v954_v49  ;;  %1534 = vmatprep.subr.bf16.mxu1 %v2205_v0 }
 0x261   : > { %v958_v51 = vsel %vm900_vm10, %v956_v50, -1e+30 }
 0x262   : > { %v960_v52 = vsel %vm959_vm11, %v958_v51, -inf }
 0x263   : > { %961 = vmax.xlane.f32.xlu0 %v960_v52  ;;  %1535 = vmatpush3.bf16.msra.mxu1 %v1752_v62 }
 0x264   : > { %1548 = vmatprep.subr.bf16.mxu1 %v2205_v0 }
 0x2ec   : > { %v962_v53 = vpop.xlane.xlu0 %961 }
 0x2ed   : > { %v963_v54 = vsub.f32 %v958_v51, %v962_v53 }
 0x2ef   : > { %v964_v25 = vmul.f32 1.442695, %v963_v54 }
 0x2f1   : > { %1773 = vpow2.f32 %v964_v25 }
 0x2fe   : > { %v1774_v55 = vpop.eup %1773 }
 0x2ff   : > { %v966_v56 = vsel %vm959_vm11, %v1774_v55, 0.0 }
 0x300   : > { %967 = vadd.xlane.f32.xlu1 %v966_v56 }
 0x389   : > { %v968_v58 = vpop.xlane.xlu1 %967 }
 0x38a   : > { %1775 = vrcp.f32 %v968_v58 }
 0x38b   : > { %1777 = vpow2.f32 %v1470_v5 }
 0x397   : > { %v1776_v59 = vpop.eup %1775 }
 0x398   : > { %v970_v60 = vmul.f32 %v1776_v59, %v1774_v55  ;;  %v1778_v19 = vpop.eup %1777 }
 0x399   : > { %v687_v11 = vadd.f32 1.0, %v1778_v19 }
 0x39a   : > { %v971_v61 = vpack.c.bf16 %v970_v60, %v970_v60 }
 0x39b   : > { %1779 = vrcp.f32 %v687_v11 }
 0x39c   : > { %1529 = vmatmul.mubr.msk.bf16.vlgmr.msra.gmra.mxu0 %vm959_vm11, %v971_v61 }
 0x39d   : > { %1544 = vmatprep.mubr.msk.bf16.mxu0 %vm2206_vm0, %v2205_v0  ;;  %1541 = vmatpush3.bf16.msra.mxu0 %v1753_v6 }
 0x39e   : > { %1542 = vmatprep.subr.bf16.mxu0 %v2205_v0 }
 0x3a1   : > { %1543 = vmatpush3.bf16.msra.mxu0 %v1755_v9 }
 0x3a8   : > { %v1780_v13 = vpop.eup %1779 }
 0x45c   : > { %v1012_v8 = vpop.f32.mrf.mxu0 }
 0x45d   : > { %v1023_v63 = vpack.c.bf16 %v1012_v8, %v1012_v8  ;;  %1019 = vrot.lane.b32.xlu0 %v1012_v8, %s2209_s14  ;;  %s2832_s14 = sld [smem:[#allocation47_spill]] }
 0x45e   : > { %v1530_v1 = vpop.f32.mrf.mxu0 }
 0x45f   : > { %1537 = vmatmul.mubr.msk.bf16.vlgmr.msra.gmra.mxu1 %vm640_vm1, %v1023_v63 }
 0x460   : > { %v1015_v2 = vpop.f32.mrf.mxu0  ;;  %1552 = vmatprep.mubr.msk.bf16.mxu1 %vm2206_vm0, %v2205_v0  ;;  %1549 = vmatpush3.bf16.msra.mxu1 %v1754_v7 }
 0x461   : > { %1550 = vmatprep.subr.bf16.mxu1 %v2205_v0 }
 0x462   : > { %v1531_v3 = vpop.f32.mrf.mxu0 }
 0x463   : > { %s2670_s20 = scalar_lea.hbm %s2832_s14, %s1490_s12 }
 0x464   : > { %1551 = vmatpush3.bf16.msra.mxu1 %v1756_v10 }
 0x4cf   : > { %v1020_v14 = vpop.permute.xlu0 %1019 }
 0x4d0   : > { %v1022_v15 = vmul.f32 %v1780_v13, %v1020_v14 }
 0x4d2   : > { %v1102_v16 = vpack.c.bf16 %v1022_v15, %v1022_v15 }
 0x4d4   : > { %1108 = vrot.lane.b32.xlu1 %v1102_v16, %s2210_s16  ;;  %s2057_s16 = scalar_lea.vmem %s2056_s3, 256 }
 0x4d5   : > { %p2059_p7 = scmp.lt.s32.totalorder %s2057_s16, %s2051_s11 }
 0x4d7   : > { %p2060_p8 = por %p2059_p7, %p2058_p0 }
 0x4d9   : > { %p2061_p9 = pnand %p2060_p8, %p2054_p13 }
 0x51f   : > { %v1084_v18 = vpop.f32.mrf.mxu1 }
 0x520   : > { %v1085_v20 = vadd.f32 %v1476_v17, %v1084_v18 }
 0x521   : > { %v1538_v21 = vpop.f32.mrf.mxu1 }
 0x522   : > { %v1480_v22 = vmul.f32 -1.442695, %v1085_v20 }
 0x523   : > { %v1087_v23 = vpop.f32.mrf.mxu1 }
 0x524   : > { %1781 = vpow2.f32 %v1480_v22 }
 0x525   : > { %v1539_v0 = vpop.f32.mrf.mxu1 }
 0x531   : > { %v1782_v24 = vpop.eup %1781 }
 0x532   : > { %v1093_v26 = vadd.f32 1.0, %v1782_v24 }
 0x534   : > { %1783 = vrcp.f32 %v1093_v26 }
 0x541   : > { %v1784_v27 = vpop.eup %1783 }
 0x542   : > { %v1096_v28 = vmul.f32 %v1784_v27, %v2585_v4 }
 0x544   : > { %v1097_v29 = vpack.c.bf16 %v1096_v28, %v1096_v28 }
 0x546   : > { %v1109_v30 = vpop.permute.xlu1 %1108  ;;  %1553 = vmatmul.mubr.msk.bf16.vlgmr.msra.gmra.mxu1 %vm640_vm1, %v1097_v29 }
 0x547   : > { %1545 = vmatmul.mubr.msk.bf16.vlgmr.msra.gmra.mxu0 %vm640_vm1, %v1109_v30 }
 0x606   : > { %v1214_v31 = vpop.f32.mrf.mxu1 }
 0x607   : > { %v1159_v32 = vpop.f32.mrf.mxu0 }
 0x608   : > { %v1215_v4 = vadd.f32 %v1214_v31, %v1159_v32  ;;  %v1554_v34 = vpop.f32.mrf.mxu1 }
 0x609   : > { %v1546_v35 = vpop.f32.mrf.mxu0 }
 0x60a   : > { %v1227_v36 = vadd.f32 %v1487_v33, %v1215_v4  ;;  %v1217_v37 = vpop.f32.mrf.mxu1 }
 0x60b   : > { %v1162_v38 = vpop.f32.mrf.mxu0 }
 0x60c   : > { %v1555_v39 = vpop.f32.mrf.mxu1  ;;  %1229 = vst.msk [vmem:[%s610_s21] sm:$0xff] %vm1228_vm13, %v1227_v36 }
 0x60d   : > { %v1547_v40 = vpop.f32.mrf.mxu0 }
 0x60e   : > { %2064 = shalt.err (!%p2061_p9)
}
 0x60f   : > { %s2065_s2 = scalar_lea.hbm %s2670_s20, 128  ;;  %s2069_s1 = scalar_lea.hbm %s2832_s14, 512 }
 0x610   : > { %p2066_p12 = scmp.ne.s32.totalorder %s2670_s20, %s2065_s2  ;;  %p2070_p10 = scmp.lt.s32.totalorder %s2670_s20, %s2832_s14 }
 0x611   : > { %p2071_p6 = scmp.lt.s32.totalorder %s2069_s1, %s2065_s2 }
 0x612   : > { %p2067_p4 = pnand %p2066_p12, %p2833_p5 }
 0x613   : > { %p2072_p11 = por %p2071_p6, %p2070_p10 }
 0x614   : > { %p2068_p2 = pneg %p2067_p4 }
 0x616   : > { %p2073_p3 = pnand %p2072_p11, %p2068_p2 }
 0x618   : > { %2076 = shalt.err (!%p2073_p3)
}
 0x619   : > { %1590 = dma.vmem_to_hbm [thread:$0]  (%p2833_p5), %s2672_s28, 128, %s2670_s20, %s1231_s9  }
 0x61a PF: > { %s2834_s19 = sld [smem:[#allocation27_spill]]  ;;  %p1643_p1 = scmp.ge.s32.totalorder %s2191_s13, 2 }
 0x61b   : > { %s2835_s7 = sld [smem:[#allocation35_spill]] }
 0x620   : > { %s1258_s12 = sand.u32 1, %s2834_s19  }
 0x621   : > { %p2836_p13 = scmp.ne.s32.totalorder %s2835_s7, 0  ;;  %s1259_s21 = scalar_lea.sflag [#allocation4], %s1258_s12 }
 0x623   : > { %p1625_p0 = pnand %p1643_p1, %p2836_p13 }
 0x625   : > { %p1626_p7 = pneg %p1625_p0 }
 0x627   : > { %2146 = dma.done.wait (%p1626_p7), %s1259_s21, 128  }
 0x628   : > { %2148 = vsyncadd (%p1626_p7), %s1259_s21, 4294967168  ;;  %s35_s13 = sadd.s32 1, %s2191_s13   ;;  %s2837_s28 = sld [smem:[#allocation30_spill]] }
 0x629   : > { %p32_p8 = scmp.ge.s32.totalorder %s35_s13, 6   ;;  %s2838_s29 = sld [smem:[#allocation32_spill]] }
 0x62a   : > { %s2839_s8 = sld [smem:[#allocation33_spill]]  ;;  %s2840_s21 = smov %s2155_s22 }
 0x62b   : > { %s2841_s22 = smov %s2159_s23  ;;  %s2842_s23 = smov %s2498_s27 }
 0x62c   : > { %s2843_s24 = smov %s2167_s25  ;;  %s2844_s25 = smov %s2171_s26 }
 0x62d   : > { %s2845_s26 = smov %s2501_s4  ;;  %34 = sbr.rel (!%p32_p8) target bundleno = 28 (0x1c), region = 165 }
 0x62e   : > { %s2846_s27 = smov %s2837_s28  ;;  %s2847_s28 = smov %s2187_s30 }
 0x630   : > { %s2848_s30 = smov %s2839_s8 }
 0x632   :  { %1264 = vsyncpa [#allocation3], 1 }
 0x633   :  { %1266 = vsyncpa [#allocation3 + $0x1], 1 }
 0x634   :  { %1267 = vsyncpa [#allocation6], 1 }
 0x635   :  { %1269 = vsyncpa [#allocation6 + $0x1], 1 }
 0x636   :  { %1270 = vsyncpa [#allocation9], 1 }
 0x637   :  { %1271 = vsyncpa [#allocation12], 1 }
 0x638   :  { %1272 = vsyncpa [#allocation15], 1 }
 0x639   :  { %1273 = vsyncpa [#allocation18], 1 }
 0x63a   :  { %1274 = vsyncpa [#allocation4], 1 }
 0x63b   :  { %1276 = vsyncpa [#allocation4 + $0x1], 1 }

</bundles_post_ra>
